<compile_context>
chip_gen: v5e
topology: v5e:2x2
jax: 0.10.0
libtpu: 0.0.40
codegen_flags: <defaults>
</compile_context>

<pallas_src>
import jax
import jax.numpy as jnp
from jax.experimental import pallas as pl
from jax.experimental.pallas import tpu as pltpu


# ----------------------------- kernels ------------------------------------- #

def _hitters_kernel_mxu(xT_ref, w1T_ref, b1_ref, w2T8_ref, b2_ref, o_ref):
    # First linear, lane-major: (H, F) @ (F, TB) -> (H, TB), f32 accumulation.
    hT = jnp.dot(w1T_ref[...], xT_ref[...], preferred_element_type=jnp.float32)
    hT = jnp.maximum(hT + b1_ref[...], 0.0)          # bias + ReLU on the VPU
    # Dropout(0.4): identity at inference time (eval mode).
    # Second linear on the (otherwise idle) MXU: (8, H) @ (H, TB) -> (8, TB);
    # rows 1..7 of w2T8 are zero padding, keep row 0 only.
    out8 = jnp.dot(w2T8_ref[...], hT, preferred_element_type=jnp.float32)
    o_ref[...] = out8[0:1, :] + b2_ref[0]             # b2: scalar from SMEM


def _hitters_kernel_vpu(xT_ref, w1T_ref, b1_ref, w2_ref, b2_ref, o_ref):
    hT = jnp.dot(w1T_ref[...], xT_ref[...], preferred_element_type=jnp.float32)
    hT = jnp.maximum(hT + b1_ref[...], 0.0)
    # Dropout(0.4): identity at inference time.
    # Second linear as VPU multiply + sublane reduce: (H, TB)*(H, 1) -> (1, TB).
    out = jnp.sum(hT * w2_ref[...], axis=0, keepdims=True)
    o_ref[...] = out + b2_ref[0]


# ----------------------------- helpers -------------------------------------- #

def _round_up(v, m):
    return -(-v // m) * m


def _choose_batch_tile(B, block_b):
    """Batch tile in lanes: multiple of 128, no bigger than needed, and capped
    so the grid keeps >=2 steps when B allows it (engages both v7x cores)."""
    tb = 128 * pl.cdiv(min(int(block_b), B), 128)
    if B >= 256:
        tb = min(tb, (B // 2) // 128 * 128)
    elif B >= 128:
        tb = min(tb, (B // 128) * 128)
    return max(tb, 128)


# ----------------------------- wrappers ------------------------------------- #

def hitters_forward_features_major(xT, w1, b1, w2, b2, *, block_b=16384,
                                   mxu_second_layer=True):
    """xT: (F, B) features-major activations (f32 or bf16) -> (B,) float32.

    Fast path: x is read straight from HBM in its stored dtype; no wrapper-side
    transpose / cast / pad pass over the dominant input.
    """
    F, B = xT.shape
    H = w1.shape[1]  # 50

    # Tiny parameter tensors: reshape/cast freely (negligible traffic).
    w1T = jnp.transpose(w1).astype(xT.dtype)              # (H, F)
    b1c = b1.reshape(H, 1).astype(jnp.float32)            # (H, 1)
    b2s = b2.reshape(-1).astype(jnp.float32)               # (1,) scalar -> SMEM
    if mxu_second_layer:
        w2a = jnp.zeros((8, H), jnp.float32).at[0].set(
            w2.reshape(H).astype(jnp.float32))             # (8, H), rows 1..7 = 0
        w2_spec = pl.BlockSpec((8, H), lambda i: (0, 0))
        kernel = _hitters_kernel_mxu
    else:
        w2a = w2.reshape(H, 1).astype(jnp.float32)          # (H, 1)
        w2_spec = pl.BlockSpec((H, 1), lambda i: (0, 0))
        kernel = _hitters_kernel_vpu

    TB = _choose_batch_tile(B, block_b)
    Bp = B
    if TB > B:  # only for tiny batches (B < 128); negligible extra bytes
        xT = jnp.pad(xT, ((0, 0), (0, TB - B)))
        Bp = TB
    grid = (pl.cdiv(Bp, TB),)   # ragged last block handled by Pallas masking

    # VMEM budget: double-buffered x tile + f32 hidden intermediate (+ slack).
    itemsize = jnp.dtype(xT.dtype).itemsize
    sublane = 8 * (4 // itemsize)                  # 8 (f32) / 16 (bf16) packing
    vmem_est = (2 * _round_up(F, sublane) * TB * itemsize
                + 2 * _round_up(H, 8) * TB * 4
                + 4 * TB * 4 + (1 << 20))
    cp = dict(dimension_semantics=("parallel",))
    if vmem_est > 30 * 1024 * 1024:            # above the default scoped limit
        cp["vmem_limit_bytes"] = int(min(vmem_est, 60 * 1024 * 1024))

    out = pl.pallas_call(
        kernel,
        out_shape=jax.ShapeDtypeStruct((1, Bp), jnp.float32),
        grid=grid,
        in_specs=[
            pl.BlockSpec((F, TB), lambda i: (0, i)),        # activations, tiled
            pl.BlockSpec((H, F), lambda i: (0, 0)),         # resident weights
            pl.BlockSpec((H, 1), lambda i: (0, 0)),         # resident bias
            w2_spec,                                        # resident 2nd layer
            pl.BlockSpec(memory_space=pltpu.MemorySpace.SMEM),   # b2 scalar
        ],
        out_specs=pl.BlockSpec((1, TB), lambda i: (0, i)),  # lane-dense output
        compiler_params=pltpu.CompilerParams(**cp),
    )(xT, w1T, b1c, w2a, b2s)

    # torch.flatten of the (B, 1) output -> (B,); drop any tiny-batch padding.
    return out[0, :B]


def hitters_forward(x, w1, b1, w2, b2, **kwargs):
    """Torch-signature entry point: x (B, ...) -> (B,).

    NOTE: the transpose below is one full extra HBM pass over x; prefer
    hitters_forward_features_major when the producer can emit (F, B) directly.
    """
    x = x.reshape(x.shape[0], -1)          # nn.Flatten()
    return hitters_forward_features_major(jnp.transpose(x), w1, b1, w2, b2,
                                           **kwargs)


def init_params(key, input_size, hidden=50):
    """Deterministic init mimicking PyTorch nn.Linear defaults
    (uniform(-1/sqrt(fan_in), 1/sqrt(fan_in)))."""
    k1, k2, k3, k4 = jax.random.split(key, 4)
    bound1 = 1.0 / jnp.sqrt(jnp.float32(input_size))
    bound2 = 1.0 / jnp.sqrt(jnp.float32(hidden))
    w1 = jax.random.uniform(k1, (input_size, hidden), jnp.float32, -bound1, bound1)
    b1 = jax.random.uniform(k2, (1, hidden), jnp.float32, -bound1, bound1)
    w2 = jax.random.uniform(k3, (hidden, 1), jnp.float32, -bound2, bound2)
    b2 = jax.random.uniform(k4, (1, 1), jnp.float32, -bound2, bound2)
    return w1, b1, w2, b2


if __name__ == "__main__":
    key = jax.random.PRNGKey(0)
    kx, kx2, kp = jax.random.split(key, 3)

    F = 19  # Hitters predictors after one-hot encoding
    w1, b1, w2, b2 = init_params(kp, F)

    def reference(xx):
        h = jnp.maximum(xx @ w1 + b1, 0.0)
        return jnp.reshape(h @ w2 + b2, (-1,))

    # Small torch-style (B, F) input.
    B = 8
    x = jax.random.normal(kx, (B, F), jnp.float32)
    y_ref = reference(x)

    # Default path (MXU second layer).  Tolerance covers TPU default matmul
    # precision (bf16 MXU passes) differing between kernel and XLA reference.
    y = hitters_forward(x, w1, b1, w2, b2)
    jax.block_until_ready(y)
    assert y.shape == (B,)
    assert jnp.allclose(y, y_ref, atol=5e-2, rtol=5e-2)

    # VPU second-layer variant.
    y_vpu = hitters_forward(x, w1, b1, w2, b2, mxu_second_layer=False)
    jax.block_until_ready(y_vpu)
    assert jnp.allclose(y_vpu, y_ref, atol=5e-2, rtol=5e-2)

    # Features-major fast path (no wrapper passes over x): f32 and bf16 x.
    xT = jnp.transpose(x)                 # demo "producer" emitting (F, B)
    y_fm = hitters_forward_features_major(xT, w1, b1, w2, b2)
    jax.block_until_ready(y_fm)
    assert jnp.allclose(y_fm, y_ref, atol=5e-2, rtol=5e-2)

    y_bf16 = hitters_forward_features_major(xT.astype(jnp.bfloat16),
                                            w1, b1, w2, b2)
    jax.block_until_ready(y_bf16)
    assert y_bf16.shape == (B,)
    assert jnp.allclose(y_bf16, y_ref, atol=1e-1, rtol=1e-1)

    # Multi-step grid + ragged last block (B not a multiple of the batch tile).
    B2 = 300
    x2 = jax.random.normal(kx2, (B2, F), jnp.float32)
    y2 = hitters_forward(x2, w1, b1, w2, b2)
    jax.block_until_ready(y2)
    assert y2.shape == (B2,)
    assert jnp.allclose(y2, reference(x2), atol=5e-2, rtol=5e-2)

    # TODO(synk): training-mode Dropout(0.4) (mask + 1/(1-p) scaling) is not
    # implemented; this kernel covers eval-mode inference only.
    print("KERNEL_OK")
</pallas_src>

<mosaic_0001>
module attributes {stable_mosaic.version = 11 : i64} {
  func.func @_hitters_kernel_mxu(%arg0: i32, %arg1: memref<19x128xf32, #tpu.memory_space<vmem>>, %arg2: memref<50x19xf32, #tpu.memory_space<vmem>>, %arg3: memref<50x1xf32, #tpu.memory_space<vmem>>, %arg4: memref<8x50xf32, #tpu.memory_space<vmem>>, %arg5: memref<1xf32, #tpu.memory_space<smem>>, %arg6: memref<1x128xf32, #tpu.memory_space<vmem>>) attributes {dimension_semantics = [#tpu.dimension_semantics<parallel>], iteration_bounds = array<i64: 1>, scalar_prefetch = 0 : i64, scratch_operands = 0 : i64, tpu.core_type = #tpu.core_type<tc>, window_params = [{transform_indices = @transform_0, window_bounds = array<i64: 19, 128>}, {pipeline_mode = #tpu.pipeline_mode<synchronous>, transform_indices = @transform_1, window_bounds = array<i64: 50, 19>}, {pipeline_mode = #tpu.pipeline_mode<synchronous>, transform_indices = @transform_2, window_bounds = array<i64: 50, 1>}, {pipeline_mode = #tpu.pipeline_mode<synchronous>, transform_indices = @transform_3, window_bounds = array<i64: 8, 50>}, {transform_indices = @transform_4, window_bounds = array<i64: 1>}, {transform_indices = @transform_5, window_bounds = array<i64: 1, 128>}]} {
    %c0 = arith.constant 0 : index
    %c0_0 = arith.constant 0 : index
    %0 = vector.load %arg2[%c0, %c0_0] : memref<50x19xf32, #tpu.memory_space<vmem>>, vector<50x19xf32>
    %c0_1 = arith.constant 0 : index
    %c0_2 = arith.constant 0 : index
    %1 = vector.load %arg1[%c0_1, %c0_2] : memref<19x128xf32, #tpu.memory_space<vmem>>, vector<19x128xf32>
    %cst = arith.constant dense<0.000000e+00> : vector<50x128xf32>
    %2 = tpu.matmul %0, %1, %cst {dimension_numbers = #tpu.dot_dimension_numbers<[1], [0], [0], [1], [0, 0, 1, 1], [], []>} : vector<50x19xf32>, vector<19x128xf32>, vector<50x128xf32> -> vector<50x128xf32>
    %c0_3 = arith.constant 0 : index
    %c0_4 = arith.constant 0 : index
    %3 = vector.load %arg3[%c0_3, %c0_4] : memref<50x1xf32, #tpu.memory_space<vmem>>, vector<50x1xf32>
    %4 = vector.broadcast %3 : vector<50x1xf32> to vector<50x128xf32>
    %5 = arith.addf %2, %4 : vector<50x128xf32>
    %cst_5 = arith.constant 0.000000e+00 : f32
    %6 = vector.broadcast %cst_5 : f32 to vector<50x128xf32>
    %7 = arith.maximumf %5, %6 : vector<50x128xf32>
    %c0_6 = arith.constant 0 : index
    %c0_7 = arith.constant 0 : index
    %8 = vector.load %arg4[%c0_6, %c0_7] : memref<8x50xf32, #tpu.memory_space<vmem>>, vector<8x50xf32>
    %cst_8 = arith.constant dense<0.000000e+00> : vector<8x128xf32>
    %9 = tpu.matmul %8, %7, %cst_8 {dimension_numbers = #tpu.dot_dimension_numbers<[1], [0], [0], [1], [0, 0, 1, 1], [], []>} : vector<8x50xf32>, vector<50x128xf32>, vector<8x128xf32> -> vector<8x128xf32>
    %10 = vector.extract_strided_slice %9 {offsets = [0, 0], sizes = [1, 128], strides = [1, 1]} : vector<8x128xf32> to vector<1x128xf32>
    %c0_9 = arith.constant 0 : index
    %11 = memref.load %arg5[%c0_9] : memref<1xf32, #tpu.memory_space<smem>>
    %12 = vector.broadcast %11 : f32 to vector<1x128xf32>
    %13 = arith.addf %10, %12 : vector<1x128xf32>
    %c0_10 = arith.constant 0 : index
    %c0_11 = arith.constant 0 : index
    %14 = vector.load %arg6[%c0_10, %c0_11] : memref<1x128xf32, #tpu.memory_space<vmem>>, vector<1x128xf32>
    tpu.vector_store %arg6[%c0_10, %c0_11], %13 {strides = array<i32>} : memref<1x128xf32, #tpu.memory_space<vmem>>, vector<1x128xf32>,
    return
  }
  func.func @transform_0(%arg0: i32) -> (i32, i32) {
    %c0_i32 = arith.constant 0 : i32
    %c0_i32_0 = arith.constant 0 : i32
    return %c0_i32, %arg0 : i32, i32
  }
  func.func @transform_1(%arg0: i32) -> (i32, i32) {
    %c0_i32 = arith.constant 0 : i32
    %c0_i32_0 = arith.constant 0 : i32
    %c0_i32_1 = arith.constant 0 : i32
    return %c0_i32, %c0_i32_0 : i32, i32
  }
  func.func @transform_2(%arg0: i32) -> (i32, i32) {
    %c0_i32 = arith.constant 0 : i32
    %c0_i32_0 = arith.constant 0 : i32
    %c0_i32_1 = arith.constant 0 : i32
    return %c0_i32, %c0_i32_0 : i32, i32
  }
  func.func @transform_3(%arg0: i32) -> (i32, i32) {
    %c0_i32 = arith.constant 0 : i32
    %c0_i32_0 = arith.constant 0 : i32
    %c0_i32_1 = arith.constant 0 : i32
    return %c0_i32, %c0_i32_0 : i32, i32
  }
  func.func @transform_4(%arg0: i32) -> i32 {
    %c0_i32 = arith.constant 0 : i32
    %c0_i32_0 = arith.constant 0 : i32
    return %c0_i32 : i32
  }
  func.func @transform_5(%arg0: i32) -> (i32, i32) {
    %c0_i32 = arith.constant 0 : i32
    %c0_i32_0 = arith.constant 0 : i32
    return %c0_i32, %arg0 : i32, i32
  }
}

</mosaic_0001>

<bundles_post_ra>
// kernel: tpu_custom_call.1
= control target key start
LH: loop header
LB: loop body
LE: loop exit
PB: predicated region body
PF: predicated region fallthrough
CT: control target
= control target key end

     0   :  { %vm96_vm0 = vcmask 1042432   ;;  %v241_v4 = vmov 0   ;;  %vm74_vm1 = vcmask 154624   ;;  %s340_s0 = inlined_call_operand.vmem [shape: f32[19,128], index: 0, kind: input, shape index: {}]   ;;  %s341_s1 = inlined_call_operand.vmem [shape: f32[50,19], index: 1, kind: input, shape index: {}]   ;;  %s342_s2 = inlined_call_operand.vmem [shape: f32[50,1], index: 2, kind: input, shape index: {}]   ;;  %s343_s3 = inlined_call_operand.vmem [shape: f32[8,50], index: 3, kind: input, shape index: {}]   ;;  %s344_s4 = inlined_call_operand.<no memory space> [shape: f32[1], index: 4, kind: input, shape index: {}]   ;;  %s345_s5 = inlined_call_operand.hbm [shape: f32[1,128], index: 5, kind: output, shape index: {}]  }
   0x1   :  { %v31_v0 = vld [vmem:[%s340_s0 + $0x10] sm:$0x7]  ;;  %v30_v1 = vld [vmem:[%s340_s0 + $0x8] sm:$0xff]  ;;  %v29_v3 = vld [vmem:[%s340_s0] sm:$0xff]  ;;  %212 = vset.pattern.permute.xlu0 %v241_v4 }
   0x2   :  { %204 = vmatpush.msk.msra.mxu2 %vm96_vm0, %v31_v0  ;;  %205 = vmatpush.msk.msra.mxu3 %vm96_vm0, %v31_v0  ;;  %v38_v2 = vld [vmem:[%s342_s2 + $0x30] sm:$0x3]  ;;  %v27_v6 = vld [vmem:[%s341_s1 + $0x28] sm:$0xff]  ;;  %v22_v7 = vld [vmem:[%s341_s1] sm:$0xff] }
   0x3   :  { %194 = vmatpush.msk.msra.mxu0 %vm96_vm0, %v31_v0  ;;  %v24_v5 = vld [vmem:[%s341_s1 + $0x10] sm:$0xff]  ;;  %71 = vperm.xlu0 %212, %v38_v2   ;;  %v36_v8 = vld [vmem:[%s342_s2 + $0x20] sm:$0xff] }
   0x4   :  { %206 = vmatpush.msra.mxu2 %v30_v1  ;;  %207 = vmatpush.msra.mxu3 %v30_v1 }
   0x5   :  { %114 = vmatpush.msra.mxu0 %v30_v1 }
   0x6   :  { %208 = vmatpush.msra.mxu2 %v29_v3  ;;  %209 = vmatpush.msra.mxu3 %v29_v3 }
   0x7   :  { %11 = vsyncpa [#allocation4], 0  ;;  %197 = vmatmul.msk.f32.vlgmr.msra.gmra.mxu2 %vm74_vm1, %v24_v5  ;;  %200 = vmatmul.msk.f32.vlgmr.msra.gmra.mxu3 %vm74_vm1, %v27_v6  ;;  %v34_v9 = vld [vmem:[%s342_s2 + $0x10] sm:$0xff]  ;;  %v37_v10 = vld [vmem:[%s342_s2 + $0x28] sm:$0xff]  ;;  %vm150_vm2 = vcmask 1041408   ;;  %vm146_vm3 = vcmask 408576   ;;  %v175_v47 = vstv %s344_s4 }
   0x8   :  { %115 = vmatpush.msra.mxu0 %v29_v3  ;;  %213 = vset.pattern.permute.xlu1 %v241_v4  ;;  %v25_v11 = vld [vmem:[%s341_s1 + $0x18] sm:$0xff]  ;;  %v28_v12 = vld [vmem:[%s341_s1 + $0x30] sm:$0x3]  ;;  %v23_v13 = vld [vmem:[%s341_s1 + $0x8] sm:$0xff]  ;;  %s242_s28 = smov [#allocation3]   ;;  %s185_s6 = sshll.u32 %s345_s5, 4  ;;  %s186_s6 = int_to_ptr.hbm [resolvable:$true] %s185_s6 }
   0x9   :  { %195 = vmatmul.msk.f32.vlgmr.msra.gmra.mxu0 %vm74_vm1, %v22_v7  ;;  %61 = vperm.xlu1 %213, %v36_v8   ;;  %v35_v14 = vld [vmem:[%s342_s2 + $0x18] sm:$0xff]  ;;  %v33_v15 = vld [vmem:[%s342_s2 + $0x8] sm:$0xff]  ;;  %v32_v16 = vld [vmem:[%s342_s2] sm:$0xff]  ;;  %s183_s29 = sshll.u32 %s242_s28, 4  ;;  %s184_s29 = int_to_ptr.vmem [resolvable:$true] %s183_s29 }
   0xa   :  { %214 = vset.pattern.permute.xlu2 %v241_v4  ;;  %v26_v17 = vld [vmem:[%s341_s1 + $0x20] sm:$0xff] }
   0xb   :  { %51 = vperm.xlu2 %214, %v34_v9   ;;  %66 = vperm.xlu0 %212, %v37_v10   ;;  %v145_v46 = vld [vmem:[%s343_s3] sm:$0xff] }
   0xf   :  { %198 = vmatmul.msk.f32.gmra.mxu2 %vm74_vm1, %v25_v11  ;;  %201 = vmatmul.msk.f32.gmra.mxu3 %vm74_vm1, %v28_v12 }
  0x11   :  { %196 = vmatmul.msk.f32.gmra.mxu0 %vm74_vm1, %v23_v13  ;;  %56 = vperm.xlu1 %213, %v35_v14  }
  0x13   :  { %46 = vperm.xlu2 %214, %v33_v15   ;;  %41 = vperm.xlu0 %212, %v32_v16  }
  0x17   :  { %199 = vmatmul.msk.f32.gmra.mxu2 %vm74_vm1, %v26_v17 }
  0x65   :  { %v52_v28 = vpop.permute.xlu2 %51 }
  0x6d   :  { %v47_v35 = vpop.permute.xlu2 %46 }
  0x75   :  { %v72_v18 = vpop.permute.xlu0 %71 }
  0x7b   :  { %v62_v21 = vpop.permute.xlu1 %61 }
  0x7d   :  { %v67_v22 = vpop.permute.xlu0 %66 }
  0x83   :  { %v57_v31 = vpop.permute.xlu1 %56 }
  0x85   :  { %v42_v39 = vpop.permute.xlu0 %41 }
  0x86   :  { %v117_v23 = vpop.f32.mrf.mxu0 }
  0x87   :  { %v118_v43 = vadd.f32 %v117_v23, %v42_v39 }
  0x89   :  { %v138_v45 = vmax.f32 %v118_v43, 0.0 }
  0x8a   :  { %v123_v19 = vpop.f32.mrf.mxu2  ;;  %v132_v20 = vpop.f32.mrf.mxu3 }
  0x8b   :  { %v133_v26 = vadd.f32 %v132_v20, %v67_v22  ;;  %v124_v37 = vadd.f32 %v123_v19, %v52_v28 }
  0x8d   :  { %v143_v30 = vmax.f32 %v133_v26, 0.0  ;;  %v140_v42 = vmax.f32 %v124_v37, 0.0 }
  0x8e   :  { %v120_v36 = vpop.f32.mrf.mxu0 }
  0x8f   :  { %v121_v41 = vadd.f32 %v120_v36, %v47_v35 }
  0x91   :  { %v139_v44 = vmax.f32 %v121_v41, 0.0 }
  0x92   :  { %v126_v24 = vpop.f32.mrf.mxu2  ;;  %v135_v25 = vpop.f32.mrf.mxu3 }
  0x93   :  { %v136_v27 = vadd.f32 %v135_v25, %v72_v18  ;;  %v127_v33 = vadd.f32 %v126_v24, %v57_v31 }
  0x95   :  { %v144_v29 = vmax.f32 %v136_v27, 0.0  ;;  %v141_v40 = vmax.f32 %v127_v33, 0.0 }
  0x97   :  { %202 = vmatpush.msk.msra.mxu1 %vm150_vm2, %v144_v29 }
  0x99   :  { %164 = vmatpush.msra.mxu1 %v143_v30 }
  0x9a   :  { %v129_v32 = vpop.f32.mrf.mxu2 }
  0x9b   :  { %v130_v34 = vadd.f32 %v129_v32, %v62_v21 }
  0x9d   :  { %v142_v38 = vmax.f32 %v130_v34, 0.0 }
  0x9f   :  { %165 = vmatpush.msra.mxu1 %v142_v38 }
  0xa1   :  { %166 = vmatpush.msra.mxu1 %v141_v40 }
  0xa3   :  { %167 = vmatpush.msra.mxu1 %v140_v42 }
  0xa5   :  { %168 = vmatpush.msra.mxu1 %v139_v44 }
  0xa7   :  { %169 = vmatpush.msra.mxu1 %v138_v45 }
  0xa8   :  { %203 = vmatmul.msk.f32.vlgmr.msra.gmra.mxu1 %vm146_vm3, %v145_v46 }
 0x125   :  { %v171_v48 = vpop.f32.mrf.mxu1 }
 0x126   :  { %v176_v49 = vadd.f32 %v175_v47, %v171_v48 }
 0x128   :  { %177 = vst [vmem:[#allocation3] sm:$0x1] %v176_v49 }
 0x129   :  { %188 = dma.vmem_to_hbm [thread:$0]  %s184_s29, 16, %s186_s6, [#allocation4]  }
 0x12a   :  { %239 = dma.done.wait [#allocation4], 16  }
 0x12b   :  { %240 = vsyncadd [#allocation4], 4294967280 }
 0x12c   :  { %193 = vsyncpa [#allocation4], 1 }

</bundles_post_ra>
